<compile_context>
chip_gen: v7x
topology: tpu7x:2x2x1
jax: 0.10.0
libtpu: 0.0.40
codegen_flags: <defaults>
</compile_context>

<pallas_src>
import functools

import jax
import jax.numpy as jnp
from jax import lax
from jax.experimental import pallas as pl
from jax.experimental.pallas import tpu as pltpu


# ----------------------------------------------------------------------------
# One-time probe: does lax.rev lower in Pallas/Mosaic on this build?
# ----------------------------------------------------------------------------
_REV_LOWERS = None


def _rev_lowers():
    global _REV_LOWERS
    if _REV_LOWERS is None:
        def probe(x_ref, o_ref):
            x = x_ref[...]
            o_ref[...] = lax.rev(lax.rev(x, (2,)), (1,))   # lane rev + sublane rev

        try:
            fn = pl.pallas_call(
                probe, out_shape=jax.ShapeDtypeStruct((2, 8, 128), jnp.float32))
            jax.jit(fn).lower(jnp.zeros((2, 8, 128), jnp.float32)).compile()
            _REV_LOWERS = True
        except Exception:   # any lowering failure -> exact matmul fallback
            _REV_LOWERS = False
    return _REV_LOWERS


def _reverse_axis(x, axis, use_rev):
    """Exactly reverse `axis` (one of the two minor dims) of a block."""
    axis = axis % x.ndim
    if use_rev:
        return lax.rev(x, (axis,))
    # Fallback: exact 0/1 permutation matmul with the symmetric anti-identity.
    n = x.shape[axis]
    row = lax.broadcasted_iota(jnp.int32, (n, n), 0)
    col = lax.broadcasted_iota(jnp.int32, (n, n), 1)
    anti = (row + col == n - 1).astype(jnp.float32)
    r, c = x.shape[-2], x.shape[-1]
    x3 = x.reshape(-1, r, c).astype(jnp.float32)          # leading dims only
    anti3 = jnp.broadcast_to(anti, (x3.shape[0], n, n))
    if axis == x.ndim - 1:        # reverse lanes:    y = x @ anti
        y3 = jnp.einsum('brk,bkc->brc', x3, anti3,
                        preferred_element_type=jnp.float32,
                        precision=lax.Precision.HIGHEST)
    else:                         # reverse sublanes: y = anti @ x
        y3 = jnp.einsum('brk,bkc->brc', anti3, x3,
                        preferred_element_type=jnp.float32,
                        precision=lax.Precision.HIGHEST)
    return y3.reshape(x.shape).astype(x.dtype)


# ----------------------------------------------------------------------------
# Kernel: reverse one axis of the samples whose SMEM mask entry is nonzero.
# ----------------------------------------------------------------------------
def _flip_kernel(mask_ref, x_ref, o_ref, *, spb, axis, use_rev):
    """mask_ref: (N,) int32 in SMEM (scalar-prefetched per-sample flags).
    x_ref / o_ref: block of `spb` whole samples."""
    base = pl.program_id(0) * spb
    x = x_ref[...]
    rev = _reverse_axis(x, axis, use_rev)
    for s in range(spb):                       # static unroll; spb is small
        flip = mask_ref[base + s] != 0
        o_ref[s] = jnp.where(flip, rev[s], x[s])


# ----------------------------------------------------------------------------
# Blocking helpers
# ----------------------------------------------------------------------------
def _round_up(v, m):
    return (v + m - 1) // m * m


def _pick_samples_per_block(n_samples, padded_sample_bytes,
                            target_bytes=2 << 20, min_grid_steps=4,
                            max_spb=32):
    """Whole samples per block: largest divisor of N under the VMEM byte
    target, while keeping >= min_grid_steps blocks so the parallel grid axis
    can shard across TensorCores (v7x)."""
    cap = max(1, target_bytes // max(padded_sample_bytes, 1))
    cap = min(cap, max_spb)
    cap = min(cap, max(1, n_samples // min(min_grid_steps, n_samples)))
    spb = 1
    for d in range(1, min(cap, n_samples) + 1):
        if n_samples % d == 0:
            spb = d
    return spb


def _apply_flip(x, sample_mask, axis):
    """x: (N, C, H, W); sample_mask: (N,) bool.  Reverses `axis` (-1: W
    horizontal, -2: H vertical) of the samples where sample_mask is True."""
    N, C, H, W = x.shape
    itemsize = x.dtype.itemsize
    use_rev = _rev_lowers()
    mask_i32 = sample_mask.astype(jnp.int32)          # -> SMEM scalar prefetch

    if axis in (-1, 3):
        # Horizontal: flatten (C, H) so the flipped axis is the lane axis.
        xk = x.reshape(N, C * H, W)
        padded = _round_up(C * H, 8) * _round_up(W, 128) * itemsize
        spb = _pick_samples_per_block(N, padded)
        block = (spb, C * H, W)
        index_map = lambda i, m: (i, 0, 0)
        kern_axis = -1
    elif axis in (-2, 2):
        # Vertical: natural NCHW layout, flip the sublane (H) axis in-kernel.
        xk = x
        padded = C * _round_up(H, 8) * _round_up(W, 128) * itemsize
        spb = _pick_samples_per_block(N, padded)
        block = (spb, C, H, W)
        index_map = lambda i, m: (i, 0, 0, 0)
        kern_axis = -2
    else:
        raise ValueError(f'unsupported flip axis {axis}')

    out = pl.pallas_call(
        functools.partial(_flip_kernel, spb=spb, axis=kern_axis,
                          use_rev=use_rev),
        out_shape=jax.ShapeDtypeStruct(xk.shape, x.dtype),
        grid_spec=pltpu.PrefetchScalarGridSpec(
            num_scalar_prefetch=1,
            grid=(N // spb,),
            in_specs=[pl.BlockSpec(block, index_map)],
            out_specs=pl.BlockSpec(block, index_map),
        ),
        compiler_params=pltpu.CompilerParams(
            dimension_semantics=("parallel",)),
        cost_estimate=pl.CostEstimate(
            flops=0, transcendentals=0,
            bytes_accessed=2 * x.size * itemsize + 4 * N),
    )(mask_i32, xk)
    return out.reshape(N, C, H, W)


# ----------------------------------------------------------------------------
# Module forward
# ----------------------------------------------------------------------------
def random_flip_aug(x, key, task_name, p=0.1):
    """JAX/Pallas port of RandomFlipAug.forward.  Returns (aug_x, mask)."""
    N = x.shape[0]
    k_mask, k_coin = jax.random.split(key)

    # per-sample Bernoulli(p) mask (torch.rand(N) < p)
    mask = jax.random.uniform(k_mask, (N,)) < p

    if 'reacher' in task_name:
        horizontal = jax.random.uniform(k_coin, ()) < 0.5
        aug_x = lax.cond(horizontal,
                         lambda op: _apply_flip(op, mask, axis=-1),
                         lambda op: _apply_flip(op, mask, axis=-2),
                         x)
    elif any(t in task_name for t in ['acrobot', 'pendulum', 'cartpole', 'cup']):
        aug_x = _apply_flip(x, mask, axis=-1)
    else:
        raise ValueError('Not implemented equivariant flip augmentation')

    return aug_x, mask


if __name__ == "__main__":
    key = jax.random.PRNGKey(0)
    k_x, k_aug, k_mask2, k_reach = jax.random.split(key, 4)

    N, C, H, W = 2, 4, 16, 16
    x = jax.random.normal(k_x, (N, C, H, W), dtype=jnp.float32)

    # --- horizontal-flip branch (cartpole etc.) via the full module ---------
    aug_x, mask = random_flip_aug(x, k_aug, "cartpole_swingup", p=0.5)
    aug_x = jax.block_until_ready(aug_x)
    mask = jax.block_until_ready(mask)
    ref = jnp.where(mask[:, None, None, None], x[:, :, :, ::-1], x)
    assert aug_x.shape == x.shape and aug_x.dtype == x.dtype
    assert mask.shape == (N,) and mask.dtype == jnp.bool_
    assert jnp.allclose(aug_x, ref, atol=1e-6, rtol=0.0)

    # --- vertical-flip kernel (used by the 'reacher' branch) ----------------
    mask_v = jax.random.uniform(k_mask2, (N,)) < 0.5
    aug_v = jax.block_until_ready(_apply_flip(x, mask_v, axis=-2))
    ref_v = jnp.where(mask_v[:, None, None, None], x[:, :, ::-1, :], x)
    assert jnp.allclose(aug_v, ref_v, atol=1e-6, rtol=0.0)

    # --- 'reacher' branch end-to-end (exercises lax.cond over both kernels) -
    aug_r, mask_r = random_flip_aug(x, k_reach, "reacher_easy", p=0.5)
    aug_r = jax.block_until_ready(aug_r)
    assert aug_r.shape == x.shape and mask_r.shape == (N,)

    print("KERNEL_OK")
</pallas_src>

<mosaic_0001>
module attributes {stable_mosaic.version = 11 : i64} {
  func.func @_flip_kernel(%arg0: i32, %arg1: memref<2xi32, #tpu.memory_space<smem>>, %arg2: memref<1x64x16xf32, #tpu.memory_space<vmem>>, %arg3: memref<1x64x16xf32, #tpu.memory_space<vmem>>) attributes {dimension_semantics = [#tpu.dimension_semantics<parallel>], iteration_bounds = array<i64: 2>, scalar_prefetch = 1 : i64, scratch_operands = 0 : i64, tpu.core_type = #tpu.core_type<tc>, window_params = [{transform_indices = @transform_0, window_bounds = array<i64: 1, 64, 16>}, {transform_indices = @transform_1, window_bounds = array<i64: 1, 64, 16>}]} {
    %c1_i32 = arith.constant 1 : i32
    %0 = arith.muli %arg0, %c1_i32 : i32
    %c0 = arith.constant 0 : index
    %c0_0 = arith.constant 0 : index
    %c0_1 = arith.constant 0 : index
    %1 = vector.load %arg2[%c0, %c0_0, %c0_1] : memref<1x64x16xf32, #tpu.memory_space<vmem>>, vector<1x64x16xf32>
    %2 = tpu.iota {dimensions = array<i32: 0>} : vector<16x16xi32>
    %3 = tpu.iota {dimensions = array<i32: 1>} : vector<16x16xi32>
    %4 = arith.addi %2, %3 : vector<16x16xi32>
    %c15_i32 = arith.constant 15 : i32
    %5 = vector.broadcast %c15_i32 : i32 to vector<16x16xi32>
    %6 = arith.cmpi eq, %4, %5 : vector<16x16xi32>
    %7 = arith.extui %6 : vector<16x16xi1> to vector<16x16xi32>
    %8 = arith.sitofp %7 : vector<16x16xi32> to vector<16x16xf32>
    %9 = vector.shape_cast %8 : vector<16x16xf32> to vector<1x16x16xf32>
    "tpu.trace_start"() <{level = 10 : i32, message = "brk,bkc->brc"}> : () -> ()
    %cst = arith.constant dense<0.000000e+00> : vector<1x64x16xf32>
    %10 = tpu.matmul %1, %9, %cst {dimension_numbers = #tpu.dot_dimension_numbers<[2], [1], [1], [2], [0, 0, 0, 1, 1, 2], [0], [0]>, precision = #tpu.contract_precision<fp32>} : vector<1x64x16xf32>, vector<1x16x16xf32>, vector<1x64x16xf32> -> vector<1x64x16xf32>
    "tpu.trace_stop"() : () -> ()
    %c0_i32 = arith.constant 0 : i32
    %11 = arith.addi %0, %c0_i32 : i32
    %12 = arith.index_cast %11 : i32 to index
    %13 = memref.load %arg1[%12] : memref<2xi32, #tpu.memory_space<smem>>
    %c0_i32_2 = arith.constant 0 : i32
    %14 = arith.cmpi ne, %13, %c0_i32_2 : i32
    %15 = vector.shape_cast %10 : vector<1x64x16xf32> to vector<64x16xf32>
    %16 = vector.shape_cast %1 : vector<1x64x16xf32> to vector<64x16xf32>
    %17 = arith.select %14, %15, %16 : vector<64x16xf32>
    %c0_3 = arith.constant 0 : index
    %c0_4 = arith.constant 0 : index
    %c0_5 = arith.constant 0 : index
    %18 = vector.load %arg3[%c0_3, %c0_4, %c0_5] : memref<1x64x16xf32, #tpu.memory_space<vmem>>, vector<1x64x16xf32>
    %19 = vector.shape_cast %18 : vector<1x64x16xf32> to vector<64x16xf32>
    %20 = vector.shape_cast %17 : vector<64x16xf32> to vector<1x64x16xf32>
    tpu.vector_store %arg3[%c0_3, %c0_4, %c0_5], %20 {strides = array<i32>} : memref<1x64x16xf32, #tpu.memory_space<vmem>>, vector<1x64x16xf32>,
    return
  }
  func.func @transform_0(%arg0: i32, %arg1: memref<2xi32, #tpu.memory_space<smem>>) -> (i32, i32, i32) {
    %c0_i32 = arith.constant 0 : i32
    %c0_i32_0 = arith.constant 0 : i32
    %c0_i32_1 = arith.constant 0 : i32
    return %arg0, %c0_i32, %c0_i32_0 : i32, i32, i32
  }
  func.func @transform_1(%arg0: i32, %arg1: memref<2xi32, #tpu.memory_space<smem>>) -> (i32, i32, i32) {
    %c0_i32 = arith.constant 0 : i32
    %c0_i32_0 = arith.constant 0 : i32
    %c0_i32_1 = arith.constant 0 : i32
    return %arg0, %c0_i32, %c0_i32_0 : i32, i32, i32
  }
}

</mosaic_0001>

<bundles_post_ra>
// kernel: tpu_custom_call.1
= control target key start
LH: loop header
LB: loop body
LE: loop exit
PB: predicated region body
PF: predicated region fallthrough
CT: control target
= control target key end

     0   :  { %s1508_s0 = inlined_call_operand.vmem [shape: s32[2], index: 0, kind: input, shape index: {}]   ;;  %s1509_s1 = inlined_call_operand.vmem [shape: f32[2,64,16], index: 1, kind: input, shape index: {}]   ;;  %s1510_s2 = inlined_call_operand.vmem [shape: f32[2,64,16], index: 2, kind: output, shape index: {}]  }
   0x1   :  { %s7_s11 = sshll.u32 %s1508_s0, 4  ;;  %s8_s11 = int_to_ptr.vmem [resolvable:$true] %s7_s11 }
   0x2   :  { %s1258_s12 = scalar_lea.vmem %s8_s11, 16  ;;  %p1263_p1 = scmp.lt.s32.totalorder %s8_s11, %s8_s11 }
   0x3   :  { %p1259_p0 = scmp.ne.s32.totalorder %s8_s11, %s1258_s12  ;;  %p1264_p2 = scmp.lt.s32.totalorder %s1258_s12, %s1258_s12 }
   0x5   :  { %p1265_p3 = por %p1264_p2, %p1263_p1 }
   0x7   :  { %p1266_p4 = pnand %p1265_p3, %p1259_p0 }
   0x9   :  { %1269 = shalt.err (!%p1266_p4)  }
   0xa   :  { %s1280_s13 = smov [#allocation3]  }
   0xb   :  { %10 = dma.vmem_to_smem %s8_s11, 16, %s1280_s13, [#allocation2] }
   0xc   :  { %1274 = dma.done.wait [#allocation2], 16 }
   0xd   :  { %1275 = vsyncadd [#allocation2], 4294967280 }
   0xe   :  { %12 = sfence }
   0xf   :  { %s1301_s14 = smov 0  }
  0x10 LB: > { %s1307_s0 = sadd.s32 4294967295, %s1278_s14   ;;  %p1010_p5 = scmp.ge.s32.totalorder %s1278_s14, 1  ;;  %s1278_s14 = sphi %s1301_s14, %s18_s14  }
  0x11   : > { %p94_p6 = scmp.lt.s32.totalorder %s1278_s14, 3 }
  0x13   : > { %p95_p7 = pnand %p1010_p5, %p94_p6 }
  0x14   : > { %v132_v0 = vlaneseq (!%p95_p7)  ;;  %p114_p8 = scmp.lt.s32.totalorder (!%p95_p7), %s1307_s0, 1  ;;  %vm145_vm0 = vcmask (!%p95_p7), 130048   ;;  %v1281_v9 = vmov (!%p95_p7), 0.0   ;;  %v1282_v26 = vmov (!%p95_p7), 1.0|1.0   ;;  %s930_s20 = sld [smem:[#allocation3 + %s1307_s0]] (!%p95_p7) }
  0x15   : > { %98 = sbr.rel (%p95_p7) target bundleno = 306 (0x132), region = 24 }
  0x16   : > { %v133_v1 = vshrl.u32 (!%p95_p7), %v132_v0, 7  ;;  %v136_v2 = vand.u32 (!%p95_p7), 127, %v132_v0 }
  0x18   : > { %v134_v3 = vadd.s32 (!%p95_p7), 8, %v133_v1  ;;  %v137_v4 = vadd.s32 (!%p95_p7), %v136_v2, %v133_v1 }
  0x1a   : > { %v138_v5 = vadd.s32 (!%p95_p7), %v136_v2, %v134_v3  ;;  %vm139_vm1 = vcmp.eq.s32.totalorder (!%p95_p7), %v137_v4, 15  ;;  %p931_p9 = scmp.ne.s32.totalorder (!%p95_p7), %s930_s20, 0 }
  0x1b   : > { %v1015_v10 = vsel (!%p95_p7), %vm139_vm1, 1.0, %v1281_v9 }
  0x1c   : > { %s1313_s15 = scalar_select %p114_p8, %s1307_s0, 1  ;;  %vm140_vm2 = vcmp.eq.s32.totalorder %v138_v5, 15  ;;  %v319_v16 = vsub.f32 %v1015_v10, %v1015_v10 }
  0x1d   : > { %v1016_v20 = vsel %vm140_vm2, 1.0, %v1281_v9  ;;  %vm1353_vm3 = vmpackc.low %vm140_vm2, %vm139_vm1  ;;  %s932_s21 = scalar_select %p931_p9, 1, 0 }
  0x1e   : > { %s1025_s16 = sshll.u32 %s1313_s15, 6  ;;  %v326_v25 = vsub.f32 %v1016_v20, %v1016_v20  ;;  %1196 = vmatprep.subr.msk.bf16.mxu0 %vm1353_vm3, %v1282_v26  ;;  %1184 = vmatprep.subr.msk.bf16.mxu1 %vm1353_vm3, %v1282_v26  ;;  %v320_v31 = vand.u32 4294901760, %v319_v16 }
  0x1f   : > { %s1321_s19 = scalar_lea.vmem %s1509_s1, %s1025_s16  ;;  %1198 = vmatpush3.bf16.msk.msra.mxu0 %vm1353_vm3, %v1282_v26  ;;  %1186 = vmatpush3.bf16.msk.msra.mxu1 %vm1353_vm3, %v1282_v26  ;;  %v933_v21 = vstv %s932_s21  ;;  %s1463_s24 = scalar_lea.vmem %s1510_s2, %s1025_s16 }
  0x20   : > { %v1324_v6 = vld [vmem:[%s1321_s19] sm:$0xff]  ;;  %v1327_v7 = vld [vmem:[%s1321_s19 + $0x8] sm:$0xff]  ;;  %v1330_v8 = vld [vmem:[%s1321_s19 + $0x10] sm:$0xff]  ;;  %v327_v37 = vand.u32 4294901760, %v326_v25  ;;  %v321_v39 = vsub.f32 %v319_v16, %v320_v31  ;;  %v1191_v2 = vpack.c.bf16 %v326_v25, %v319_v16  ;;  %vm1454_vm4 = vcmp.eq.s32.totalorder %v933_v21, 1 }
  0x21   : > { %v147_v11 = vsel %vm145_vm0, %v1324_v6, 0  ;;  %v150_v12 = vsel %vm145_vm0, %v1327_v7, 0  ;;  %v153_v13 = vsel %vm145_vm0, %v1330_v8, 0  ;;  %v1340_v14 = vld [vmem:[%s1321_s19 + $0x18] sm:$0xff]  ;;  %v1343_v15 = vld [vmem:[%s1321_s19 + $0x20] sm:$0xff]  ;;  %v1350_v19 = vld [vmem:[%s1321_s19 + $0x28] sm:$0xff] }
  0x22   : > { %v1345_v17 = vand.u32 4294901760, %v147_v11  ;;  %v1347_v18 = vand.u32 4294901760, %v150_v12  ;;  %v1357_v22 = vand.u32 4294901760, %v153_v13  ;;  %v156_v23 = vsel %vm145_vm0, %v1340_v14, 0  ;;  %v1405_v46 = vld [vmem:[%s1321_s19 + $0x30] sm:$0xff]  ;;  %v1410_v51 = vld [vmem:[%s1321_s19 + $0x38] sm:$0xff] }
  0x23   : > { %v159_v24 = vsel %vm145_vm0, %v1343_v15, 0  ;;  %v1375_v29 = vand.u32 4294901760, %v156_v23  ;;  %v162_v33 = vsel %vm145_vm0, %v1350_v19, 0  ;;  %v328_v45 = vsub.f32 %v326_v25, %v327_v37 }
  0x24   : > { %v1367_v27 = vsub.f32 %v147_v11, %v1345_v17  ;;  %v1373_v28 = vsub.f32 %v150_v12, %v1347_v18  ;;  %v1384_v30 = vsub.f32 %v153_v13, %v1357_v22  ;;  %v1386_v32 = vand.u32 4294901760, %v159_v24 }
  0x25   : > { %v1393_v36 = vsub.f32 %v156_v23, %v1375_v29  ;;  %v1399_v41 = vand.u32 4294901760, %v162_v33  ;;  %v322_v47 = vand.u32 4294901760, %v321_v39  ;;  %v1199_v48 = vpack.c.bf16 %v327_v37, %v320_v31 }
  0x26   : > { %v239_v34 = vand.u32 4294901760, %v1367_v27  ;;  %v249_v35 = vand.u32 4294901760, %v1373_v28  ;;  %v259_v38 = vand.u32 4294901760, %v1384_v30  ;;  %v1397_v40 = vsub.f32 %v159_v24, %v1386_v32 }
  0x27   : > { %v269_v44 = vand.u32 4294901760, %v1393_v36  ;;  %v329_v54 = vand.u32 4294901760, %v328_v45  ;;  %1200 = vmatprep.subr.bf16.mxu0 %v1199_v48  ;;  %v1414_v57 = vsub.f32 %v162_v33, %v1399_v41  ;;  %v165_v59 = vsel %vm145_vm0, %v1405_v46, 0 }
  0x28   : > { %1139 = vmatprep.mubr.f32.mxu0 %v239_v34  ;;  %v240_v42 = vsub.f32 %v1367_v27, %v239_v34  ;;  %v250_v43 = vsub.f32 %v1373_v28, %v249_v35  ;;  %v260_v49 = vsub.f32 %v1384_v30, %v259_v38  ;;  %v279_v50 = vand.u32 4294901760, %v1397_v40 }
  0x29   : > { %1140 = vmatmul.mubr.f32.vlgmr.msra.gmra.mrb[0].mxu0 %v249_v35  ;;  %v270_v55 = vsub.f32 %v1393_v36, %v269_v44  ;;  %v1187_v60 = vpack.c.bf16 %v329_v54, %v322_v47  ;;  %v297_v61 = vand.u32 4294901760, %v165_v59  ;;  %v168_v62 = vsel %vm145_vm0, %v1410_v51, 0 }
  0x2a   : > { %v241_v52 = vand.u32 4294901760, %v240_v42  ;;  %1142 = vmatprep.mubr.f32.mxu0 %v259_v38  ;;  %v251_v53 = vand.u32 4294901760, %v250_v43  ;;  %v261_v56 = vand.u32 4294901760, %v260_v49  ;;  %v280_v58 = vsub.f32 %v1397_v40, %v279_v50  ;;  %1202 = vmatpush3.bf16.msra.mxu0 %v1199_v48 }
  0x2b   : > { %v271_v63 = vand.u32 4294901760, %v270_v55  ;;  %v289_v0 = vand.u32 4294901760, %v1414_v57  ;;  %v307_v1 = vand.u32 4294901760, %v168_v62  ;;  %1188 = vmatprep.subr.bf16.mxu1 %v1187_v60  ;;  %v298_v4 = vsub.f32 %v165_v59, %v297_v61  ;;  %1204 = vmatprep.subr.msk.bf16.mxu0 %vm1353_vm3, %v1282_v26 }
  0x2c   : > { %1091 = vmatprep.mubr.f32.mxu1 %v241_v52  ;;  %v281_v3 = vand.u32 4294901760, %v280_v58 }
  0x2d   : > { %1092 = vmatmul.mubr.f32.vlgmr.msra.gmra.mrb[0].mxu1 %v251_v53  ;;  %1143 = vmatmul.mubr.f32.gmra.mrb[2].mxu0 %v269_v44  ;;  %v290_v5 = vsub.f32 %v1414_v57, %v289_v0  ;;  %v308_v9 = vsub.f32 %v168_v62, %v307_v1  ;;  %v299_v10 = vand.u32 4294901760, %v298_v4 }
  0x2e   : > { %1094 = vmatprep.mubr.f32.mxu1 %v261_v56  ;;  %1190 = vmatpush3.bf16.msra.mxu1 %v1187_v60 }
  0x2f   : > { %1145 = vmatprep.mubr.f32.mxu0 %v279_v50  ;;  %1192 = vmatprep.subr.bf16.mxu1 %v1191_v2  ;;  %v291_v11 = vand.u32 4294901760, %v290_v5  ;;  %v309_v12 = vand.u32 4294901760, %v308_v9  ;;  %v300_v13 = vsub.f32 %v298_v4, %v299_v10 }
  0x31   : > { %1095 = vmatmul.mubr.f32.gmra.mrb[2].mxu1 %v271_v63  ;;  %1146 = vmatmul.mubr.f32.gmra.mrb[4].mxu0 %v289_v0  ;;  %v310_v16 = vsub.f32 %v308_v9, %v309_v12  ;;  %v301_v20 = vand.u32 4294901760, %v300_v13 }
  0x32   : > { %1097 = vmatprep.mubr.f32.mxu1 %v281_v3  ;;  %1148 = vmatprep.mubr.f32.mxu0 %v299_v10 }
  0x33   : > { %v311_v23 = vand.u32 4294901760, %v310_v16 }
  0x35   : > { %1098 = vmatmul.mubr.f32.gmra.mrb[4].mxu1 %v291_v11  ;;  %1149 = vmatmul.mubr.f32.gmra.mrb[6].mxu0 %v309_v12 }
  0x36   : > { %1100 = vmatprep.mubr.f32.mxu1 %v301_v20  ;;  %1155 = vmatprep.mubr.f32.mxu0 %v1345_v17 }
  0x39   : > { %1101 = vmatmul.mubr.f32.gmra.mrb[6].mxu1 %v311_v23  ;;  %1156 = vmatmul.mubr.f32.vlgmr.msra.gmra.mrb[0].mxu0 %v1347_v18 }
  0x3a   : > { %1107 = vmatprep.mubr.f32.mxu1 %v1345_v17  ;;  %1158 = vmatprep.mubr.f32.mxu0 %v1357_v22 }
  0x3b   : > { %1206 = vmatpush3.bf16.msk.msra.mxu0 %vm1353_vm3, %v1282_v26 }
  0x3d   : > { %1108 = vmatmul.mubr.f32.vlgmr.msra.gmra.mrb[0].mxu1 %v1347_v18  ;;  %1159 = vmatmul.mubr.f32.gmra.mrb[2].mxu0 %v1375_v29 }
  0x3e   : > { %1194 = vmatpush3.bf16.msra.mxu1 %v1191_v2  ;;  %1110 = vmatprep.mubr.f32.mxu1 %v1357_v22 }
  0x3f   : > { %1161 = vmatprep.mubr.f32.mxu0 %v1386_v32 }
  0x41   : > { %1111 = vmatmul.mubr.f32.gmra.mrb[2].mxu1 %v1375_v29  ;;  %1162 = vmatmul.mubr.f32.gmra.mrb[4].mxu0 %v1399_v41 }
  0x42   : > { %1113 = vmatprep.mubr.f32.mxu1 %v1386_v32  ;;  %1164 = vmatprep.mubr.f32.mxu0 %v297_v61 }
  0x45   : > { %1114 = vmatmul.mubr.f32.gmra.mrb[4].mxu1 %v1399_v41  ;;  %1165 = vmatmul.mubr.f32.gmra.mrb[6].mxu0 %v307_v1 }
  0x46   : > { %1116 = vmatprep.mubr.f32.mxu1 %v297_v61  ;;  %1171 = vmatprep.mubr.f32.mxu0 %v1345_v17 }
  0x49   : > { %1117 = vmatmul.mubr.f32.gmra.mrb[6].mxu1 %v307_v1  ;;  %1172 = vmatmul.mubr.f32.vlgmr.msra.gmra.mrb[0].mxu0 %v1347_v18 }
  0x4a   : > { %1123 = vmatprep.mubr.f32.mxu1 %v1367_v27  ;;  %1174 = vmatprep.mubr.f32.mxu0 %v1357_v22 }
  0x4d   : > { %1124 = vmatmul.mubr.f32.vlgmr.msra.gmra.mrb[0].mxu1 %v1373_v28  ;;  %1175 = vmatmul.mubr.f32.gmra.mrb[2].mxu0 %v1375_v29 }
  0x4e   : > { %1126 = vmatprep.mubr.f32.mxu1 %v1384_v30  ;;  %1177 = vmatprep.mubr.f32.mxu0 %v1386_v32 }
  0x51   : > { %1127 = vmatmul.mubr.f32.gmra.mrb[2].mxu1 %v1393_v36  ;;  %1178 = vmatmul.mubr.f32.gmra.mrb[4].mxu0 %v1399_v41 }
  0x52   : > { %1129 = vmatprep.mubr.f32.mxu1 %v1397_v40  ;;  %1180 = vmatprep.mubr.f32.mxu0 %v297_v61 }
  0x55   : > { %1130 = vmatmul.mubr.f32.gmra.mrb[4].mxu1 %v1414_v57  ;;  %1181 = vmatmul.mubr.f32.gmra.mrb[6].mxu0 %v307_v1 }
  0x56   : > { %1132 = vmatprep.mubr.f32.mxu1 %v298_v4 }
  0x59   : > { %1133 = vmatmul.mubr.f32.gmra.mrb[6].mxu1 %v308_v9 }
 0x11c   : > { %v1173_v17 = vpop.f32.mrb[0].mxu0 }
 0x11d   : > { %v884_v18 = vpop.f32.mrb[1].mxu0 }
 0x120   : > { %v1125_v22 = vpop.f32.mrb[0].mxu1  ;;  %v1176_v25 = vpop.f32.mrb[2].mxu0 }
 0x121   : > { %v1207_v26 = vadd.f32 %v1173_v17, %v1125_v22  ;;  %v512_v27 = vpop.f32.mrb[1].mxu1  ;;  %v896_v28 = vpop.f32.mrb[3].mxu0 }
 0x122   : > { %v1208_v29 = vadd.f32 %v884_v18, %v512_v27 }
 0x123   : > { %v936_v30 = vsel %vm1454_vm4, %v1207_v26, %v1327_v7 }
 0x124   : > { %944 = vst.msk [vmem:[%s1463_s24 + $0x8] sm:$0xff] %vm145_vm0, %v936_v30  ;;  %v935_v31 = vsel %vm1454_vm4, %v1208_v29, %v1324_v6  ;;  %v1128_v32 = vpop.f32.mrb[2].mxu1  ;;  %v1179_v33 = vpop.f32.mrb[4].mxu0 }
 0x125   : > { %943 = vst.msk [vmem:[%s1463_s24] sm:$0xff] %vm145_vm0, %v935_v31  ;;  %v1209_v34 = vadd.f32 %v1176_v25, %v1128_v32  ;;  %v526_v35 = vpop.f32.mrb[3].mxu1  ;;  %v908_v36 = vpop.f32.mrb[5].mxu0 }
 0x126   : > { %v1210_v37 = vadd.f32 %v896_v28, %v526_v35 }
 0x127   : > { %v938_v7 = vsel %vm1454_vm4, %v1209_v34, %v1340_v14 }
 0x128   : > { %946 = vst.msk [vmem:[%s1463_s24 + $0x18] sm:$0xff] %vm145_vm0, %v938_v7  ;;  %v937_v6 = vsel %vm1454_vm4, %v1210_v37, %v1330_v8  ;;  %v1131_v38 = vpop.f32.mrb[4].mxu1  ;;  %v1182_v39 = vpop.f32.mrb[6].mxu0 }
 0x129   : > { %945 = vst.msk [vmem:[%s1463_s24 + $0x10] sm:$0xff] %vm145_vm0, %v937_v6  ;;  %v1211_v40 = vadd.f32 %v1179_v33, %v1131_v38  ;;  %v540_v41 = vpop.f32.mrb[5].mxu1  ;;  %v920_v42 = vpop.f32.mrb[7].mxu0 }
 0x12a   : > { %v1212_v43 = vadd.f32 %v908_v36, %v540_v41 }
 0x12b   : > { %v940_v14 = vsel %vm1454_vm4, %v1211_v40, %v1350_v19 }
 0x12c   : > { %948 = vst.msk [vmem:[%s1463_s24 + $0x28] sm:$0xff] %vm145_vm0, %v940_v14  ;;  %v939_v8 = vsel %vm1454_vm4, %v1212_v43, %v1343_v15  ;;  %v1134_v44 = vpop.f32.mrb[6].mxu1 }
 0x12d   : > { %947 = vst.msk [vmem:[%s1463_s24 + $0x20] sm:$0xff] %vm145_vm0, %v939_v8  ;;  %v1213_v45 = vadd.f32 %v1182_v39, %v1134_v44  ;;  %v554_v47 = vpop.f32.mrb[7].mxu1 }
 0x12e   : > { %v1214_v48 = vadd.f32 %v920_v42, %v554_v47 }
 0x12f   : > { %v942_v49 = vsel %vm1454_vm4, %v1213_v45, %v1410_v51 }
 0x130   : > { %950 = vst.msk [vmem:[%s1463_s24 + $0x38] sm:$0xff] %vm145_vm0, %v942_v49  ;;  %v941_v19 = vsel %vm1454_vm4, %v1214_v48, %v1405_v46 }
 0x131   : > { %949 = vst.msk [vmem:[%s1463_s24 + $0x30] sm:$0xff] %vm145_vm0, %v941_v19 }
 0x132 PF: > { %s18_s14 = sadd.s32 1, %s1278_s14  }
 0x133   : > { %p15_p10 = scmp.ge.s32.totalorder %s18_s14, 4  }
 0x135   :  { %17 = sbr.rel (!%p15_p10) target bundleno = 16 (0x10), region = 54 }

</bundles_post_ra>
